<compile_context>
chip_gen: v7x
topology: tpu7x:2x2x1
jax: 0.10.0
libtpu: 0.0.40
codegen_flags: <defaults>
</compile_context>

<pallas_src>
import functools
import math

import jax
import jax.numpy as jnp
from jax import lax
from jax.experimental import pallas as pl
from jax.experimental.pallas import tpu as pltpu


# ----------------------------------------------------------------------------
# VMEM budget (trace-time hardware query; conservative 64 MiB / v7x fallback).
# ----------------------------------------------------------------------------
def _query_vmem_budget_bytes():
    phys = 64 * 1024 * 1024
    try:
        info = pltpu.get_tpu_info()
        phys = int(getattr(info, "vmem_capacity_bytes", phys))
    except Exception:
        pass
    # ~48 MiB on v7x (64 MiB physical), capped at 96 MiB on 128 MiB chips.
    return min((phys * 3) // 4, 96 * 1024 * 1024)


_VMEM_BUDGET = _query_vmem_budget_bytes()


def _round_up(x, m):
    return ((x + m - 1) // m) * m


def _pick_tiles(n, d_pad, feat_bytes):
    """Choose (tm, tn, n_pad) from N, padded D, feature dtype and VMEM budget."""
    if n < 256:
        # Tiny batch: a single (8-aligned) block; nothing to split.
        t = _round_up(max(n, 1), 8)
        return t, t, t

    # Row tile: 128-aligned; guarantee >= 2 row blocks so both v7x TCs get work.
    tm = 256 if n >= 1024 else 128

    def vmem_bytes(tm_, tn_):
        return (2 * (tm_ + tn_) * d_pad * feat_bytes   # double-buffered row/col features
                + 2 * tm_ * tn_ * 4                    # gram + masked intermediate
                + tm_ * 128 * 4                        # accumulator scratch
                + 4 * (2 * tm_ + 4 * tn_))             # labels / validity / output

    # Column tile: largest multiple of tm (<= 1024, <= padded N) that fits.
    tn = min(1024, _round_up(n, tm))
    while tn > tm and vmem_bytes(tm, tn) > _VMEM_BUDGET:
        tn -= tm
    if vmem_bytes(tm, tn) > _VMEM_BUDGET and tm > 128:
        tm = 128  # tn stays a multiple of 128
    n_pad = _round_up(n, tn)  # tn is a multiple of tm -> n_pad divisible by both
    return tm, tn, n_pad


# ----------------------------------------------------------------------------
# Kernel
# ----------------------------------------------------------------------------
def _triplet_loss_kernel(x_row_ref, x_col_ref, t_row_ref, t_col_ref, valid_col_ref,
                         hinge_ref, acc_ref, *, margin):
    j = pl.program_id(1)
    nj = pl.num_programs(1)

    # ---- init the merged accumulator at the first column block ----
    @pl.when(j == 0)
    def _init():
        acc_ref[...] = jnp.full(acc_ref.shape, -jnp.inf, dtype=jnp.float32)

    # Gram on the MXU, contracting last dims of both operands (no transpose).
    # Features were pre-normalized (and pre-cast to bf16 if requested) in the wrapper.
    gram = lax.dot_general(
        x_row_ref[...], x_col_ref[...],
        dimension_numbers=(((1,), (1,)), ((), ())),
        preferred_element_type=jnp.float32)            # (tm, tn) f32

    t_row = t_row_ref[...]                             # (tm, 1) int32
    t_col = t_col_ref[...]                             # (1, tn) int32 (pre-transposed)
    valid = valid_col_ref[...] != 0                    # (1, tn) bool

    same_lbl = t_row == t_col                          # (tm, tn)
    mask_pos = same_lbl & valid
    mask_neg = jnp.logical_not(same_lbl) & valid

    # Mine directly on gram: for unit-norm rows d^2 = 2 - 2*g (monotone decreasing),
    # so hardest positive = min(gram | pos), hardest negative = max(gram | neg).
    pos_min = jnp.min(jnp.where(mask_pos, gram, jnp.float32(jnp.inf)),
                      axis=1, keepdims=True)           # (tm, 1)
    neg_max = jnp.max(jnp.where(mask_neg, gram, jnp.float32(-jnp.inf)),
                      axis=1, keepdims=True)           # (tm, 1)

    # Single fused RMW on one (tm, 128) accumulator:
    #   lane 0 tracks max(-gram) over positives (= -min gram), lane 1 tracks max(gram)
    #   over negatives; other lanes are don't-care.
    lane = lax.broadcasted_iota(jnp.int32, acc_ref.shape, 1)
    cand = jnp.where(lane == 0, -pos_min, neg_max)     # (tm, 128)
    acc_ref[...] = jnp.maximum(acc_ref[...], cand)

    # ---- finalize on the last column block: 2-2*g + sqrt only on selected values ----
    @pl.when(j == nj - 1)
    def _finalize():
        acc = acc_ref[...]
        g_ap = -acc[:, 0:1]                            # min gram over positives
        g_an = acc[:, 1:2]                             # max gram over negatives
        dist_ap = jnp.sqrt(jnp.maximum(2.0 - 2.0 * g_ap, 1e-12))
        dist_an = jnp.sqrt(jnp.maximum(2.0 - 2.0 * g_an, 1e-12))
        # MarginRankingLoss(y=1): max(0, dist_ap - dist_an + margin), per row.
        hinge_ref[...] = jnp.maximum(dist_ap - dist_an + jnp.float32(margin), 0.0)


# ----------------------------------------------------------------------------
# Wrapper
# ----------------------------------------------------------------------------
@functools.partial(jax.jit, static_argnames=("margin", "use_bf16_gram", "tile_override"))
def triplet_loss(inputs, targets, margin=0.3, use_bf16_gram=None, tile_override=None):
    """inputs: (N, D) features; targets: (N,) int labels. Returns scalar loss."""
    n, d = inputs.shape

    # Pre-normalize once (one XLA pass over (N, D)); exactly x / (||x||_2 + 1e-12)
    # as in the PyTorch module.
    x = inputs.astype(jnp.float32)
    x = x / (jnp.sqrt(jnp.sum(x * x, axis=-1, keepdims=True)) + 1e-12)

    if use_bf16_gram is None:
        # bf16 gram by default once the matmul dominates (3x MXU throughput on all
        # generations, half the HBM/VMEM traffic of the column stream). Small N stays
        # f32 so hard-mining ties match the f32 reference exactly.
        use_bf16_gram = n >= 1024
    feat_dtype = jnp.bfloat16 if use_bf16_gram else jnp.float32
    feat_bytes = 2 if use_bf16_gram else 4

    # Pad feature dim to full lane width (zeros change neither norms nor dots).
    d_pad = max(_round_up(d, 128), 128)
    if tile_override is not None:
        tm, tn = tile_override
        n_pad = _round_up(n, math.lcm(tm, tn))
    else:
        tm, tn, n_pad = _pick_tiles(n, d_pad, feat_bytes)

    x = jnp.pad(x, ((0, n_pad - n), (0, d_pad - d))).astype(feat_dtype)
    t = jnp.pad(targets.astype(jnp.int32), (0, n_pad - n), constant_values=-1)
    t_row = t.reshape(n_pad, 1)
    t_col = t.reshape(1, n_pad)   # pre-transposed labels: no in-kernel XLU transpose
    valid_col = (jnp.arange(n_pad, dtype=jnp.int32) < n).astype(jnp.int32).reshape(1, n_pad)

    grid = (n_pad // tm, n_pad // tn)

    hinge = pl.pallas_call(
        functools.partial(_triplet_loss_kernel, margin=float(margin)),
        out_shape=jax.ShapeDtypeStruct((n_pad, 1), jnp.float32),
        grid_spec=pltpu.PrefetchScalarGridSpec(
            num_scalar_prefetch=0,
            grid=grid,
            in_specs=[
                pl.BlockSpec((tm, d_pad), lambda i, j: (i, 0)),  # resident row features
                pl.BlockSpec((tn, d_pad), lambda i, j: (j, 0)),  # streamed col features
                pl.BlockSpec((tm, 1), lambda i, j: (i, 0)),      # row labels
                pl.BlockSpec((1, tn), lambda i, j: (0, j)),      # col labels
                pl.BlockSpec((1, tn), lambda i, j: (0, j)),      # col validity
            ],
            out_specs=pl.BlockSpec((tm, 1), lambda i, j: (i, 0)),
            scratch_shapes=[pltpu.VMEM((tm, 128), jnp.float32)],  # merged accumulator
        ),
        compiler_params=pltpu.CompilerParams(
            dimension_semantics=("parallel", "arbitrary"),
            vmem_limit_bytes=int(_VMEM_BUDGET)),
    )(x, x, t_row, t_col, valid_col)

    # Tiny O(N) reduction over the real (unpadded) rows.
    return jnp.sum(hinge[:n, 0]) / jnp.float32(n)


# ----------------------------------------------------------------------------
# Pure-JAX reference mirroring the PyTorch module.
# ----------------------------------------------------------------------------
def _triplet_loss_ref(inputs, targets, margin=0.3):
    x = inputs.astype(jnp.float32)
    x = x / (jnp.linalg.norm(x, axis=-1, keepdims=True) + 1e-12)
    sq = jnp.sum(x * x, axis=-1, keepdims=True)
    dist = sq + sq.T - 2.0 * (x @ x.T)
    dist = jnp.sqrt(jnp.clip(dist, 1e-12, None))
    mask = targets[:, None] == targets[None, :]
    dist_ap = jnp.max(jnp.where(mask, dist, -jnp.inf), axis=1)
    dist_an = jnp.min(jnp.where(mask, jnp.inf, dist), axis=1)
    return jnp.mean(jnp.maximum(dist_ap - dist_an + margin, 0.0))


if __name__ == "__main__":
    key = jax.random.PRNGKey(0)
    k1, k2 = jax.random.split(key)

    # --- Test 1: tiny batch, f32 path (single-block grid) ---
    n, d = 8, 32
    inputs = jax.random.normal(k1, (n, d), dtype=jnp.float32)
    targets = jnp.array([0, 0, 0, 0, 1, 1, 1, 1], dtype=jnp.int32)

    ref = _triplet_loss_ref(inputs, targets, margin=0.3)
    loss = triplet_loss(inputs, targets, margin=0.3)
    jax.block_until_ready(loss)
    assert jnp.allclose(loss, ref, atol=1e-5, rtol=1e-5), (loss, ref)

    # --- Test 2: bf16 gram path (looser tolerance; mining ties can flip in bf16) ---
    loss_bf16 = triplet_loss(inputs, targets, margin=0.3, use_bf16_gram=True)
    jax.block_until_ready(loss_bf16)
    assert jnp.allclose(loss_bf16, ref, atol=5e-2, rtol=5e-2), (loss_bf16, ref)

    # --- Test 3: force a multi-column-block grid to exercise the streaming
    #     accumulator (init / running max / finalize) and the parallel row axis ---
    n2, d2 = 256, 64
    inputs2 = jax.random.normal(k2, (n2, d2), dtype=jnp.float32)
    targets2 = (jnp.arange(n2, dtype=jnp.int32) // 8)  # 32 ids x 8 samples
    ref2 = _triplet_loss_ref(inputs2, targets2, margin=0.3)
    loss2 = triplet_loss(inputs2, targets2, margin=0.3, tile_override=(128, 128))
    jax.block_until_ready(loss2)
    assert jnp.allclose(loss2, ref2, atol=1e-5, rtol=1e-5), (loss2, ref2)

    print("KERNEL_OK")
</pallas_src>

<mosaic_0001>
module attributes {stable_mosaic.version = 11 : i64} {
  func.func @_triplet_loss_kernel(%arg0: i32, %arg1: i32, %arg2: memref<8x128xf32, #tpu.memory_space<vmem>>, %arg3: memref<8x128xf32, #tpu.memory_space<vmem>>, %arg4: memref<8x1xi32, #tpu.memory_space<vmem>>, %arg5: memref<1x8xi32, #tpu.memory_space<vmem>>, %arg6: memref<1x8xi32, #tpu.memory_space<vmem>>, %arg7: memref<8x1xf32, #tpu.memory_space<vmem>>, %arg8: memref<8x128xf32, #tpu.memory_space<vmem>>) attributes {dimension_semantics = [#tpu.dimension_semantics<parallel>, #tpu.dimension_semantics<arbitrary>], iteration_bounds = array<i64: 1, 1>, scalar_prefetch = 0 : i64, scratch_operands = 1 : i64, tpu.core_type = #tpu.core_type<tc>, window_params = [{transform_indices = @transform_0, window_bounds = array<i64: 8, 128>}, {transform_indices = @transform_1, window_bounds = array<i64: 8, 128>}, {transform_indices = @transform_2, window_bounds = array<i64: 8, 1>}, {transform_indices = @transform_3, window_bounds = array<i64: 1, 8>}, {transform_indices = @transform_4, window_bounds = array<i64: 1, 8>}, {transform_indices = @transform_5, window_bounds = array<i64: 8, 1>}]} {
    %c0_i32 = arith.constant 0 : i32
    %0 = arith.cmpi eq, %arg1, %c0_i32 : i32
    %1 = arith.extui %0 : i1 to i32
    %c0_i32_0 = arith.constant 0 : i32
    %2 = arith.cmpi ne, %1, %c0_i32_0 : i32
    scf.if %2 {
      %cst_24 = arith.constant 0xFF800000 : f32
      %43 = vector.broadcast %cst_24 : f32 to vector<8x128xf32>
      %c0_25 = arith.constant 0 : index
      %c0_26 = arith.constant 0 : index
      %44 = vector.load %arg8[%c0_25, %c0_26] : memref<8x128xf32, #tpu.memory_space<vmem>>, vector<8x128xf32>
      tpu.vector_store %arg8[%c0_25, %c0_26], %43 {strides = array<i32>} : memref<8x128xf32, #tpu.memory_space<vmem>>, vector<8x128xf32>,
    } else {
    }
    %c0 = arith.constant 0 : index
    %c0_1 = arith.constant 0 : index
    %3 = vector.load %arg2[%c0, %c0_1] : memref<8x128xf32, #tpu.memory_space<vmem>>, vector<8x128xf32>
    %c0_2 = arith.constant 0 : index
    %c0_3 = arith.constant 0 : index
    %4 = vector.load %arg3[%c0_2, %c0_3] : memref<8x128xf32, #tpu.memory_space<vmem>>, vector<8x128xf32>
    %cst = arith.constant dense<0.000000e+00> : vector<8x8xf32>
    %5 = tpu.matmul %3, %4, %cst {dimension_numbers = #tpu.dot_dimension_numbers<[1], [1], [0], [0], [0, 0, 1, 0], [], []>} : vector<8x128xf32>, vector<8x128xf32>, vector<8x8xf32> -> vector<8x8xf32>
    %c0_4 = arith.constant 0 : index
    %c0_5 = arith.constant 0 : index
    %6 = vector.load %arg4[%c0_4, %c0_5] : memref<8x1xi32, #tpu.memory_space<vmem>>, vector<8x1xi32>
    %c0_6 = arith.constant 0 : index
    %c0_7 = arith.constant 0 : index
    %7 = vector.load %arg5[%c0_6, %c0_7] : memref<1x8xi32, #tpu.memory_space<vmem>>, vector<1x8xi32>
    %c0_8 = arith.constant 0 : index
    %c0_9 = arith.constant 0 : index
    %8 = vector.load %arg6[%c0_8, %c0_9] : memref<1x8xi32, #tpu.memory_space<vmem>>, vector<1x8xi32>
    %c0_i32_10 = arith.constant 0 : i32
    %9 = vector.broadcast %c0_i32_10 : i32 to vector<1x8xi32>
    %10 = arith.cmpi ne, %8, %9 : vector<1x8xi32>
    %11 = vector.broadcast %6 : vector<8x1xi32> to vector<8x8xi32>
    %12 = vector.broadcast %7 : vector<1x8xi32> to vector<8x8xi32>
    %13 = arith.cmpi eq, %11, %12 : vector<8x8xi32>
    %14 = vector.broadcast %10 : vector<1x8xi1> to vector<8x8xi1>
    %15 = arith.andi %13, %14 : vector<8x8xi1>
    %cst_11 = arith.constant dense<true> : vector<8x8xi1>
    %16 = arith.xori %13, %cst_11 : vector<8x8xi1>
    %17 = vector.broadcast %10 : vector<1x8xi1> to vector<8x8xi1>
    %18 = arith.andi %16, %17 : vector<8x8xi1>
    %cst_12 = arith.constant 0x7F800000 : f32
    %19 = vector.broadcast %cst_12 : f32 to vector<8x8xf32>
    %20 = arith.select %15, %5, %19 : vector<8x8xi1>, vector<8x8xf32>
    %cst_13 = arith.constant dense<0x7F800000> : vector<8xf32>
    %21 = vector.multi_reduction <minimumf>, %20, %cst_13 [1] : vector<8x8xf32> to vector<8xf32>
    %22 = vector.shape_cast %21 : vector<8xf32> to vector<8x1xf32>
    %cst_14 = arith.constant 0xFF800000 : f32
    %23 = vector.broadcast %cst_14 : f32 to vector<8x8xf32>
    %24 = arith.select %18, %5, %23 : vector<8x8xi1>, vector<8x8xf32>
    %cst_15 = arith.constant dense<0xFF800000> : vector<8xf32>
    %25 = vector.multi_reduction <maximumf>, %24, %cst_15 [1] : vector<8x8xf32> to vector<8xf32>
    %26 = vector.shape_cast %25 : vector<8xf32> to vector<8x1xf32>
    %27 = tpu.iota {dimensions = array<i32: 1>} : vector<8x128xi32>
    %c0_i32_16 = arith.constant 0 : i32
    %28 = vector.broadcast %c0_i32_16 : i32 to vector<8x128xi32>
    %29 = arith.cmpi eq, %27, %28 : vector<8x128xi32>
    %cst_17 = arith.constant 0.000000e+00 : f32
    %30 = vector.broadcast %cst_17 : f32 to vector<8x1xf32>
    %31 = arith.subf %30, %22 : vector<8x1xf32>
    %32 = vector.shape_cast %31 : vector<8x1xf32> to vector<8x1xf32>
    %33 = vector.broadcast %32 : vector<8x1xf32> to vector<8x128xf32>
    %34 = vector.shape_cast %26 : vector<8x1xf32> to vector<8x1xf32>
    %35 = vector.broadcast %34 : vector<8x1xf32> to vector<8x128xf32>
    %36 = arith.select %29, %33, %35 : vector<8x128xi1>, vector<8x128xf32>
    %c0_18 = arith.constant 0 : index
    %c0_19 = arith.constant 0 : index
    %37 = vector.load %arg8[%c0_18, %c0_19] : memref<8x128xf32, #tpu.memory_space<vmem>>, vector<8x128xf32>
    %38 = arith.maximumf %37, %36 : vector<8x128xf32>
    %c0_20 = arith.constant 0 : index
    %c0_21 = arith.constant 0 : index
    %39 = vector.load %arg8[%c0_20, %c0_21] : memref<8x128xf32, #tpu.memory_space<vmem>>, vector<8x128xf32>
    tpu.vector_store %arg8[%c0_20, %c0_21], %38 {strides = array<i32>} : memref<8x128xf32, #tpu.memory_space<vmem>>, vector<8x128xf32>,
    %c0_i32_22 = arith.constant 0 : i32
    %40 = arith.cmpi eq, %arg1, %c0_i32_22 : i32
    %41 = arith.extui %40 : i1 to i32
    %c0_i32_23 = arith.constant 0 : i32
    %42 = arith.cmpi ne, %41, %c0_i32_23 : i32
    scf.if %42 {
      %c0_24 = arith.constant 0 : index
      %c0_25 = arith.constant 0 : index
      %43 = vector.load %arg8[%c0_24, %c0_25] : memref<8x128xf32, #tpu.memory_space<vmem>>, vector<8x128xf32>
      %44 = vector.extract_strided_slice %43 {offsets = [0, 0], sizes = [8, 1], strides = [1, 1]} : vector<8x128xf32> to vector<8x1xf32>
      %cst_26 = arith.constant 0.000000e+00 : f32
      %45 = vector.broadcast %cst_26 : f32 to vector<8x1xf32>
      %46 = arith.subf %45, %44 : vector<8x1xf32>
      %47 = vector.extract_strided_slice %43 {offsets = [0, 1], sizes = [8, 1], strides = [1, 1]} : vector<8x128xf32> to vector<8x1xf32>
      %cst_27 = arith.constant 2.000000e+00 : f32
      %48 = vector.broadcast %cst_27 : f32 to vector<8x1xf32>
      %49 = arith.mulf %48, %46 : vector<8x1xf32>
      %cst_28 = arith.constant 2.000000e+00 : f32
      %50 = vector.broadcast %cst_28 : f32 to vector<8x1xf32>
      %51 = arith.subf %50, %49 : vector<8x1xf32>
      %cst_29 = arith.constant 9.99999996E-13 : f32
      %52 = vector.broadcast %cst_29 : f32 to vector<8x1xf32>
      %53 = arith.maximumf %51, %52 : vector<8x1xf32>
      %54 = math.sqrt %53 : vector<8x1xf32>
      %cst_30 = arith.constant 2.000000e+00 : f32
      %55 = vector.broadcast %cst_30 : f32 to vector<8x1xf32>
      %56 = arith.mulf %55, %47 : vector<8x1xf32>
      %cst_31 = arith.constant 2.000000e+00 : f32
      %57 = vector.broadcast %cst_31 : f32 to vector<8x1xf32>
      %58 = arith.subf %57, %56 : vector<8x1xf32>
      %cst_32 = arith.constant 9.99999996E-13 : f32
      %59 = vector.broadcast %cst_32 : f32 to vector<8x1xf32>
      %60 = arith.maximumf %58, %59 : vector<8x1xf32>
      %61 = math.sqrt %60 : vector<8x1xf32>
      %62 = arith.subf %54, %61 : vector<8x1xf32>
      %cst_33 = arith.constant 3.000000e-01 : f32
      %63 = vector.broadcast %cst_33 : f32 to vector<8x1xf32>
      %64 = arith.addf %62, %63 : vector<8x1xf32>
      %cst_34 = arith.constant 0.000000e+00 : f32
      %65 = vector.broadcast %cst_34 : f32 to vector<8x1xf32>
      %66 = arith.maximumf %64, %65 : vector<8x1xf32>
      %c0_35 = arith.constant 0 : index
      %c0_36 = arith.constant 0 : index
      %67 = vector.load %arg7[%c0_35, %c0_36] : memref<8x1xf32, #tpu.memory_space<vmem>>, vector<8x1xf32>
      tpu.vector_store %arg7[%c0_35, %c0_36], %66 {strides = array<i32>} : memref<8x1xf32, #tpu.memory_space<vmem>>, vector<8x1xf32>,
    } else {
    }
    return
  }
  func.func @transform_0(%arg0: i32, %arg1: i32) -> (i32, i32) {
    %c0_i32 = arith.constant 0 : i32
    %c0_i32_0 = arith.constant 0 : i32
    return %arg0, %c0_i32 : i32, i32
  }
  func.func @transform_1(%arg0: i32, %arg1: i32) -> (i32, i32) {
    %c0_i32 = arith.constant 0 : i32
    %c0_i32_0 = arith.constant 0 : i32
    return %arg1, %c0_i32 : i32, i32
  }
  func.func @transform_2(%arg0: i32, %arg1: i32) -> (i32, i32) {
    %c0_i32 = arith.constant 0 : i32
    %c0_i32_0 = arith.constant 0 : i32
    return %arg0, %c0_i32 : i32, i32
  }
  func.func @transform_3(%arg0: i32, %arg1: i32) -> (i32, i32) {
    %c0_i32 = arith.constant 0 : i32
    %c0_i32_0 = arith.constant 0 : i32
    return %c0_i32, %arg1 : i32, i32
  }
  func.func @transform_4(%arg0: i32, %arg1: i32) -> (i32, i32) {
    %c0_i32 = arith.constant 0 : i32
    %c0_i32_0 = arith.constant 0 : i32
    return %c0_i32, %arg1 : i32, i32
  }
  func.func @transform_5(%arg0: i32, %arg1: i32) -> (i32, i32) {
    %c0_i32 = arith.constant 0 : i32
    %c0_i32_0 = arith.constant 0 : i32
    return %arg0, %c0_i32 : i32, i32
  }
}

</mosaic_0001>

<bundles_post_ra>
// kernel: triplet_loss.1
= control target key start
LH: loop header
LB: loop body
LE: loop exit
PB: predicated region body
PF: predicated region fallthrough
CT: control target
= control target key end

     0   :  { %v191_v0 = vmov 0.0   ;;  %vm192_vm0 = vmmov 0   ;;  %v193_v3 = vmov 0   ;;  %v110_v5 = vlaneseq  ;;  %s244_s1 = inlined_call_operand.vmem [shape: f32[8,128], index: 1, kind: input, shape index: {}, may-alias: {0,1}]   ;;  %s245_s0 = inlined_call_operand.vmem [shape: f32[8,128], index: 0, kind: input, shape index: {}, may-alias: {0,1}]   ;;  %s246_s2 = inlined_call_operand.vmem [shape: s32[8,1], index: 2, kind: input, shape index: {}]   ;;  %s247_s4 = inlined_call_operand.vmem [shape: s32[1,8], index: 4, kind: input, shape index: {}]   ;;  %s248_s3 = inlined_call_operand.vmem [shape: s32[1,8], index: 3, kind: input, shape index: {}]   ;;  %s249_s5 = inlined_call_operand.vmem [shape: f32[8,1], index: 5, kind: output, shape index: {}]  }
   0x1   :  { %176 = vmatprep.subr.mxu0 %v191_v0  ;;  %v26_v1 = vld [vmem:[%s244_s1] sm:$0xff]  ;;  %178 = vmatprep.mubr.msk.f32.mxu0 %vm192_vm0, %v191_v0  ;;  %vm194_vm4 = vmmov 1   ;;  %vm119_vm8 = vcmask 64512   ;;  %vm167_vm14 = vcmask 7168  }
   0x2   :  { %177 = vmatpush3.xpose.msra.mxu0 %v26_v1  ;;  %v25_v2 = vld [vmem:[%s245_s0] sm:$0xff]  ;;  %186 = vset.pattern.permute.xlu0 %v193_v3  ;;  %v111_v7 = vshrl.u32 %v110_v5, 7  ;;  %v128_v19 = vand.u32 127, %v110_v5  ;;  %s195_s0 = smov 127  }
   0x3   :  { %v97_v4 = vld [vmem:[%s246_s2] sm:$0xff] }
   0x4   :  { %102 = vperm.xlu0 %186, %v97_v4   ;;  %v99_v6 = vld [vmem:[%s247_s4] sm:$0x1]  ;;  %v112_v8 = vsub.s32 0, %v111_v7  ;;  %vm129_vm9 = vcmp.eq.s32.totalorder %v128_v19, 0 }
   0x5   :  { %179 = vmatmul.mubr.f32.vlgmr.msra.gmra.mrb[0].mxu0 %v25_v2  ;;  %vm100_vm1 = vcmp.ne.s32.totalorder %v99_v6, 0  ;;  %v173_v10 = vld [vmem:[%s248_s3] ss:$0 sm:$0xff] }
   0x6   :  { %v109_v9 = vsel %vm100_vm1, 1, %v193_v3 }
   0x7   :  { %v113_v12 = vrot.slane %v109_v9, %v112_v8 }
   0x9   :  { %vm114_vm3 = vcmp.eq.s32.totalorder %v113_v12, 1 }
  0x83   :  { %v103_v11 = vpop.permute.xlu0 %102 }
  0x84   :  { %vm108_vm2 = vcmp.eq.s32.totalorder %v103_v11, %v173_v10 }
  0x85   :  { %vm116_vm5 = vmxor %vm108_vm2, %vm194_vm4 }
  0x86   :  { %vm115_vm6 = vmand %vm108_vm2, %vm114_vm3 }
  0x87   :  { %vm117_vm7 = vmand %vm116_vm5, %vm114_vm3 }
  0xd8   :  { %v93_v13 = vpop.f32.mrb[0].mxu0 }
  0xd9   :  { %v180_v14 = vpop.f32.mrb[1].mxu0  ;;  %v123_v15 = vsel %vm117_vm7, %v93_v13, -inf  ;;  %v118_v16 = vsel %vm115_vm6, %v93_v13, inf }
  0xda   :  { %v124_v17 = vsel %vm119_vm8, %v123_v15, -inf  ;;  %v120_v18 = vsel %vm119_vm8, %v118_v16, inf }
  0xdb   :  { %125 = vmax.xlane.f32.xlu1 %v124_v17  ;;  %121 = vmin.xlane.f32.xlu0 %v120_v18 }
 0x168   :  { %v122_v20 = vpop.xlane.xlu0 %121  ;;  %v126_v22 = vpop.xlane.xlu1 %125 }
 0x169   :  { %v130_v21 = vsub.f32 0.0, %v122_v20 }
 0x16b   :  { %v131_v23 = vsel %vm129_vm9, %v130_v21, %v126_v22 }
 0x16c   :  { %v150_v24 = vmul.f32 2.0, %v131_v23  ;;  %v139_v32 = vsub.f32 0.0, %v131_v23 }
 0x16e   :  { %v151_v25 = vsub.f32 2.0, %v150_v24  ;;  %v140_v33 = vmul.f32 2.0, %v139_v32 }
 0x170   :  { %v152_v26 = vmax.f32 %v151_v25, 1e-12  ;;  %v141_v34 = vsub.f32 2.0, %v140_v33 }
 0x172   :  { %187 = vrsqrt.f32 %v152_v26  ;;  %vm155_vm10 = vcmp.eq.f32.partialorder %v152_v26, inf  ;;  %v158_v29 = vand.u32 2147483648, %v152_v26  ;;  %vm157_vm11 = vcmp.eq.f32.partialorder %v152_v26, 0.0 }
 0x173   :  { %v142_v35 = vmax.f32 %v141_v34, 1e-12 }
 0x175   :  { %189 = vrsqrt.f32 %v142_v35  ;;  %vm145_vm12 = vcmp.eq.f32.partialorder %v142_v35, inf  ;;  %v148_v39 = vand.u32 2147483648, %v142_v35  ;;  %vm147_vm13 = vcmp.eq.f32.partialorder %v142_v35, 0.0 }
 0x17c   :  { %v188_v27 = vpop.eup %187 }
 0x17d   :  { %v154_v28 = vmul.f32 %v188_v27, %v152_v26 }
 0x17f   :  { %v156_v30 = vsel %vm155_vm10, %v152_v26, %v154_v28  ;;  %v190_v36 = vpop.eup %189 }
 0x180   :  { %v159_v31 = vsel %vm157_vm11, %v158_v29, %v156_v30  ;;  %v144_v37 = vmul.f32 %v190_v36, %v142_v35 }
 0x181   :  { %161 = vrot.lane.b32.xlu1 %v159_v31, %s195_s0 }
 0x182   :  { %v146_v38 = vsel %vm145_vm12, %v142_v35, %v144_v37 }
 0x183   :  { %v149_v41 = vsel %vm147_vm13, %v148_v39, %v146_v38 }
 0x1f3   :  { %v162_v40 = vpop.permute.xlu1 %161 }
 0x1f4   :  { %v164_v42 = vsub.f32 %v149_v41, %v162_v40 }
 0x1f6   :  { %v165_v43 = vadd.f32 0.3, %v164_v42 }
 0x1f8   :  { %v166_v44 = vmax.f32 %v165_v43, 0.0 }
 0x1fa   :  { %168 = vst.msk [vmem:[%s249_s5] sm:$0xff] %vm167_vm14, %v166_v44 }

</bundles_post_ra>
